<compile_context>
chip_gen: v6e
topology: v6e:2x2x1
jax: 0.10.0
libtpu: 0.0.40
codegen_flags: <defaults>
</compile_context>

<pallas_src>
import functools

import jax
import jax.numpy as jnp
from jax.experimental import pallas as pl
from jax.experimental.pallas import tpu as pltpu


def _round_up(a: int, b: int) -> int:
    return (a + b - 1) // b * b


def _min_sublane(dtype) -> int:
    # Minimum second-to-last tile dim so packed dtypes don't hit masked-store /
    # layout-lowering slow paths: f32 (8,128), bf16 (16,128), int8/fp8 (32,128).
    return {4: 8, 2: 16, 1: 32}.get(jnp.dtype(dtype).itemsize, 8)


def _device_defaults():
    """Per-generation token tile / VMEM limit.

    Weights are re-streamed from HBM once per token tile, so arithmetic
    intensity ~ token_tile flops/byte in bf16 -- pick tm past the chip's ridge.
    """
    try:
        vmem = pltpu.get_tpu_info().vmem_capacity_bytes
    except Exception:
        vmem = None
    if vmem is not None and vmem >= 100 * 1024 * 1024:
        # v5e / v6e: 128 MiB VMEM.  v6e ridge ~650 flops/byte -> tm ~768;
        # v5e is already compute-bound at tm=256, the larger tile is harmless.
        return dict(token_tile=768, vmem_limit_bytes=100 * 1024 * 1024)
    if vmem is not None:
        # v7x-like: 64 MiB VMEM per TC, ridge ~310 -> tm=384 suffices.
        return dict(token_tile=384, vmem_limit_bytes=56 * 1024 * 1024)
    # Unknown chip: conservative, previously-validated settings.
    return dict(token_tile=384, vmem_limit_bytes=48 * 1024 * 1024)


_DEFAULTS = _device_defaults()


# --------------------------------------------------------------------------
# One-time weight preparation (model init), hoisted out of the forward pass.
# --------------------------------------------------------------------------
def prepare_glu_weights(w_up, w_gate, w_down, *, hidden_tile: int = 512,
                        compute_dtype=jnp.bfloat16):
    """Fuse / pad / cast the GLU weights once.

    w_up / w_gate: (dim, hidden); w_down: (hidden, dim) -- i.e. the transpose of
    nn.Linear.weight, so the kernel computes plain x @ W.

    Returns:
      w_ug:     (n_h, dim, 2*th)  -- per hidden tile h, columns [0:th) are
                W_up's tile and [th:2*th) are W_gate's tile.
      w_down_p: (n_h*th, dim)     -- hidden zero-padded down projection.
    """
    dim, hidden = w_up.shape
    if compute_dtype is not None:
        w_up = w_up.astype(compute_dtype)
        w_gate = w_gate.astype(compute_dtype)
        w_down = w_down.astype(compute_dtype)

    # Hidden tiling: zero-pad hidden up to a multiple of th (numerically inert:
    # padded gate/up columns produce 0 and the matching w_down rows are 0).
    th = min(hidden_tile, _round_up(hidden, 128))
    hidden_p = _round_up(hidden, th)
    n_h = hidden_p // th
    if hidden_p != hidden:
        pad = hidden_p - hidden
        w_up = jnp.pad(w_up, ((0, 0), (0, pad)))
        w_gate = jnp.pad(w_gate, ((0, 0), (0, pad)))
        w_down = jnp.pad(w_down, ((0, pad), (0, 0)))

    w_ug = jnp.concatenate(
        [w_up.reshape(dim, n_h, th), w_gate.reshape(dim, n_h, th)], axis=-1
    )                                          # (dim, n_h, 2*th)
    w_ug = jnp.transpose(w_ug, (1, 0, 2))      # (n_h, dim, 2*th)
    return w_ug, w_down


# --------------------------------------------------------------------------
# Kernel
# --------------------------------------------------------------------------
def _glu_kernel(x_ref, w_ug_ref, w_down_ref, o_ref, acc_ref, *, hidden_tile):
    """One (token_tile, hidden_tile) step of o = (silu(x@Wg) * (x@Wu)) @ Wd."""
    h = pl.program_id(1)

    @pl.when(h == 0)
    def _init():
        acc_ref[...] = jnp.zeros_like(acc_ref)

    x = x_ref[...]                                               # (tm, dim)
    # Single fused matmul for up & gate: w_ug block is (dim, 2*th) with W_up's
    # tile in the first th columns and W_gate's tile in the last th.
    ug = jnp.dot(x, w_ug_ref[...], preferred_element_type=jnp.float32)
    up = ug[:, :hidden_tile]
    gate = ug[:, hidden_tile:]
    gate = gate * jax.nn.sigmoid(gate)                           # SiLU in f32 (EUP)
    hvec = (gate * up).astype(w_down_ref.dtype)                  # (tm, th)
    acc_ref[...] += jnp.dot(
        hvec, w_down_ref[...], preferred_element_type=jnp.float32
    )

    @pl.when(h == pl.num_programs(1) - 1)
    def _finalize():
        o_ref[...] = acc_ref[...].astype(o_ref.dtype)


# --------------------------------------------------------------------------
# Forward pass
# --------------------------------------------------------------------------
@functools.partial(
    jax.jit,
    static_argnames=("token_tile", "vmem_limit_bytes", "weight_buffers"),
)
def _glu_forward(x, w_ug, w_down, *, token_tile, vmem_limit_bytes, weight_buffers):
    batch, seq, dim = x.shape
    n_h, _, two_th = w_ug.shape
    th = two_th // 2
    hidden_p = n_h * th
    tokens = batch * seq
    out_dtype = x.dtype

    # Cast activations to the (pre-cast) weight dtype; accumulation stays f32.
    if x.dtype != w_ug.dtype:
        x = x.astype(w_ug.dtype)

    # Token tiling (ragged token counts are zero-padded; rows sliced off after).
    tm = _round_up(min(token_tile, tokens), _min_sublane(x.dtype))
    padded_tokens = _round_up(tokens, tm)
    x2d = x.reshape(tokens, dim)
    if padded_tokens != tokens:
        x2d = jnp.pad(x2d, ((0, padded_tokens - tokens), (0, 0)))

    grid = (padded_tokens // tm, n_h)

    def _weight_spec(block_shape, index_map):
        # Deeper buffering on the weight stream for decode-sized calls.
        if weight_buffers is not None and weight_buffers != 2:
            try:
                return pl.BlockSpec(block_shape, index_map,
                                    pipeline_mode=pl.Buffered(weight_buffers))
            except TypeError:  # older jax without pipeline_mode
                pass
        return pl.BlockSpec(block_shape, index_map)

    w_bytes = (w_ug.size * w_ug.dtype.itemsize
               + w_down.size * w_down.dtype.itemsize)
    cost = pl.CostEstimate(
        # 2*T*D*2H (fused up+gate) + 2*T*H*D (down)
        flops=6 * padded_tokens * dim * hidden_p,
        transcendentals=padded_tokens * hidden_p,              # sigmoid
        bytes_accessed=(
            x2d.size * x2d.dtype.itemsize                       # activations in
            + grid[0] * w_bytes                                 # weights re-streamed per token tile
            + padded_tokens * dim * jnp.dtype(out_dtype).itemsize  # output
        ),
    )

    out2d = pl.pallas_call(
        functools.partial(_glu_kernel, hidden_tile=th),
        out_shape=jax.ShapeDtypeStruct((padded_tokens, dim), out_dtype),
        grid_spec=pltpu.PrefetchScalarGridSpec(
            num_scalar_prefetch=0,
            grid=grid,
            in_specs=[
                # x tile: constant across h, only DMA'd when i changes.
                # TODO(synk): if VMEM-squeezed on v7x, single-buffer this block
                # (pipeline_mode=pl.Buffered(1)) and spend the VMEM on weights.
                pl.BlockSpec((tm, dim), lambda i, h: (i, 0)),
                # fused up+gate weight tile, streamed over the hidden axis.
                _weight_spec((None, dim, 2 * th), lambda i, h: (h, 0, 0)),
                # down-projection weight tile, streamed over the hidden axis.
                _weight_spec((th, dim), lambda i, h: (h, 0)),
            ],
            out_specs=pl.BlockSpec((tm, dim), lambda i, h: (i, 0)),
            scratch_shapes=[pltpu.VMEM((tm, dim), jnp.float32)],
        ),
        # TODO(synk): on v7x, verify in xprof that the token axis shards across
        # both TensorCores; if one TC idles, switch axis 0 to pltpu.CORE_PARALLEL.
        compiler_params=pltpu.CompilerParams(
            dimension_semantics=("parallel", "arbitrary"),
            vmem_limit_bytes=vmem_limit_bytes,
        ),
        cost_estimate=cost,
    )(x2d, w_ug, w_down)

    if padded_tokens != tokens:
        out2d = out2d[:tokens]
    return out2d.reshape(batch, seq, dim)


def glu_forward(x, w_ug, w_down, *, token_tile=None, vmem_limit_bytes=None,
                weight_buffers=None):
    """x: (batch, seq, dim); (w_ug, w_down) from prepare_glu_weights()."""
    if token_tile is None:
        token_tile = _DEFAULTS["token_tile"]
    if vmem_limit_bytes is None:
        vmem_limit_bytes = _DEFAULTS["vmem_limit_bytes"]
    tokens = x.shape[0] * x.shape[1]
    if weight_buffers is None:
        # Decode-sized calls: per-step compute is short, so deepen weight
        # buffering to keep the HBM weight stream saturated.
        weight_buffers = 3 if tokens <= 128 else 2
    return _glu_forward(
        x, w_ug, w_down,
        token_tile=int(token_tile),
        vmem_limit_bytes=int(vmem_limit_bytes),
        weight_buffers=int(weight_buffers),
    )


def _reference(x, w_up, w_gate, w_down):
    up = x @ w_up
    gate = x @ w_gate
    gate = gate * jax.nn.sigmoid(gate)
    return (gate * up) @ w_down


if __name__ == "__main__":
    # Small demo shapes.  hidden_dim follows the module's default formula
    # (4*dim -> *2/3 -> round up to multiple_of=4) => 344, which exercises the
    # hidden zero-padding path.
    batch, seq, dim = 2, 128, 128
    multiple_of = 4
    hidden_dim = int(2 * (4 * dim) / 3)
    hidden_dim = multiple_of * ((hidden_dim + multiple_of - 1) // multiple_of)  # 344

    key = jax.random.PRNGKey(0)
    kx, ku, kg, kd = jax.random.split(key, 4)
    x = jax.random.normal(kx, (batch, seq, dim), dtype=jnp.float32)
    # Weights stored (in, out) -- the transpose of nn.Linear.weight -- so the
    # kernel computes plain x @ W.
    w_up = jax.random.normal(ku, (dim, hidden_dim), dtype=jnp.float32) * 0.05
    w_gate = jax.random.normal(kg, (dim, hidden_dim), dtype=jnp.float32) * 0.05
    w_down = jax.random.normal(kd, (hidden_dim, dim), dtype=jnp.float32) * 0.05

    ref = _reference(x, w_up, w_gate, w_down)

    # --- f32 path: hidden 344 padded to 384 (3 tiles of 128), token grid = 2.
    w_ug_f32, w_down_f32 = prepare_glu_weights(
        w_up, w_gate, w_down, hidden_tile=128, compute_dtype=None)
    out = glu_forward(x, w_ug_f32, w_down_f32, token_tile=128)
    out = jax.block_until_ready(out)
    assert out.shape == (batch, seq, dim)
    assert jnp.allclose(out, ref, atol=1e-4, rtol=1e-4), "f32 mismatch vs reference"

    # --- bf16 default path (one-time prep at "model init", device-tuned tiling).
    w_ug_bf, w_down_bf = prepare_glu_weights(w_up, w_gate, w_down)
    out_bf = glu_forward(x, w_ug_bf, w_down_bf)
    out_bf = jax.block_until_ready(out_bf)
    assert jnp.allclose(out_bf.astype(jnp.float32), ref, atol=5e-2, rtol=5e-2), \
        "bf16 mismatch vs reference"

    # --- decode-sized call: 16 tokens -> bf16 minimum sublane tile (16) and
    #     Buffered(3) weight streaming over 3 hidden tiles.
    w_ug_dec, w_down_dec = prepare_glu_weights(
        w_up, w_gate, w_down, hidden_tile=128, compute_dtype=jnp.bfloat16)
    x_dec = x[:1, :16]
    ref_dec = _reference(x_dec, w_up, w_gate, w_down)
    out_dec = glu_forward(x_dec, w_ug_dec, w_down_dec)
    out_dec = jax.block_until_ready(out_dec)
    assert out_dec.shape == x_dec.shape
    assert jnp.allclose(out_dec.astype(jnp.float32), ref_dec, atol=5e-2, rtol=5e-2), \
        "decode bf16 mismatch vs reference"

    # TODO(synk): optional v7x fp8 weight storage (per-tile scales, dequant in
    # kernel) for weight-bandwidth-bound decode -- needs calibration, not done.
    print("KERNEL_OK")
</pallas_src>

<mosaic_0001>
module attributes {stable_mosaic.version = 11 : i64} {
  func.func @_glu_kernel(%arg0: i32, %arg1: i32, %arg2: memref<128x128xf32, #tpu.memory_space<vmem>>, %arg3: memref<1x128x256xf32, #tpu.memory_space<vmem>>, %arg4: memref<128x128xf32, #tpu.memory_space<vmem>>, %arg5: memref<128x128xf32, #tpu.memory_space<vmem>>, %arg6: memref<128x128xf32, #tpu.memory_space<vmem>>) attributes {dimension_semantics = [#tpu.dimension_semantics<parallel>, #tpu.dimension_semantics<arbitrary>], iteration_bounds = array<i64: 2, 3>, scalar_prefetch = 0 : i64, scratch_operands = 1 : i64, tpu.core_type = #tpu.core_type<tc>, window_params = [{transform_indices = @transform_0, window_bounds = array<i64: 128, 128>}, {transform_indices = @transform_1, window_bounds = array<i64: 1, 128, 256>}, {transform_indices = @transform_2, window_bounds = array<i64: 128, 128>}, {transform_indices = @transform_3, window_bounds = array<i64: 128, 128>}]} {
    %c0_i32 = arith.constant 0 : i32
    %0 = arith.cmpi eq, %arg1, %c0_i32 : i32
    %1 = arith.extui %0 : i1 to i32
    %c0_i32_0 = arith.constant 0 : i32
    %2 = arith.cmpi ne, %1, %c0_i32_0 : i32
    scf.if %2 {
      %cst_14 = arith.constant 0.000000e+00 : f32
      %24 = vector.broadcast %cst_14 : f32 to vector<128x128xf32>
      %c0_15 = arith.constant 0 : index
      %c0_16 = arith.constant 0 : index
      %25 = vector.load %arg6[%c0_15, %c0_16] : memref<128x128xf32, #tpu.memory_space<vmem>>, vector<128x128xf32>
      tpu.vector_store %arg6[%c0_15, %c0_16], %24 {strides = array<i32>} : memref<128x128xf32, #tpu.memory_space<vmem>>, vector<128x128xf32>,
    } else {
    }
    %c0 = arith.constant 0 : index
    %c0_1 = arith.constant 0 : index
    %3 = vector.load %arg2[%c0, %c0_1] : memref<128x128xf32, #tpu.memory_space<vmem>>, vector<128x128xf32>
    %c0_2 = arith.constant 0 : index
    %c0_3 = arith.constant 0 : index
    %c0_4 = arith.constant 0 : index
    %4 = vector.load %arg3[%c0_2, %c0_3, %c0_4] : memref<1x128x256xf32, #tpu.memory_space<vmem>>, vector<1x128x256xf32>
    %5 = vector.shape_cast %4 : vector<1x128x256xf32> to vector<128x256xf32>
    %cst = arith.constant dense<0.000000e+00> : vector<128x256xf32>
    %6 = tpu.matmul %3, %5, %cst {dimension_numbers = #tpu.dot_dimension_numbers<[1], [0], [0], [1], [0, 0, 1, 1], [], []>} : vector<128x128xf32>, vector<128x256xf32>, vector<128x256xf32> -> vector<128x256xf32>
    %7 = vector.extract_strided_slice %6 {offsets = [0, 0], sizes = [128, 128], strides = [1, 1]} : vector<128x256xf32> to vector<128x128xf32>
    %8 = vector.extract_strided_slice %6 {offsets = [0, 128], sizes = [128, 128], strides = [1, 1]} : vector<128x256xf32> to vector<128x128xf32>
    %9 = arith.negf %8 : vector<128x128xf32>
    %10 = math.exp %9 : vector<128x128xf32>
    %cst_5 = arith.constant 1.000000e+00 : f32
    %11 = vector.broadcast %cst_5 : f32 to vector<128x128xf32>
    %12 = arith.addf %11, %10 : vector<128x128xf32>
    %13 = arith.divf %11, %12 : vector<128x128xf32>
    %14 = arith.mulf %8, %13 : vector<128x128xf32>
    %15 = arith.mulf %14, %7 : vector<128x128xf32>
    %c0_6 = arith.constant 0 : index
    %c0_7 = arith.constant 0 : index
    %16 = vector.load %arg6[%c0_6, %c0_7] : memref<128x128xf32, #tpu.memory_space<vmem>>, vector<128x128xf32>
    %c0_8 = arith.constant 0 : index
    %c0_9 = arith.constant 0 : index
    %17 = vector.load %arg4[%c0_8, %c0_9] : memref<128x128xf32, #tpu.memory_space<vmem>>, vector<128x128xf32>
    %cst_10 = arith.constant dense<0.000000e+00> : vector<128x128xf32>
    %18 = tpu.matmul %15, %17, %cst_10 {dimension_numbers = #tpu.dot_dimension_numbers<[1], [0], [0], [1], [0, 0, 1, 1], [], []>} : vector<128x128xf32>, vector<128x128xf32>, vector<128x128xf32> -> vector<128x128xf32>
    %19 = arith.addf %16, %18 : vector<128x128xf32>
    %c0_11 = arith.constant 0 : index
    %c0_12 = arith.constant 0 : index
    %20 = vector.load %arg6[%c0_11, %c0_12] : memref<128x128xf32, #tpu.memory_space<vmem>>, vector<128x128xf32>
    tpu.vector_store %arg6[%c0_11, %c0_12], %19 {strides = array<i32>} : memref<128x128xf32, #tpu.memory_space<vmem>>, vector<128x128xf32>,
    %c2_i32 = arith.constant 2 : i32
    %21 = arith.cmpi eq, %arg1, %c2_i32 : i32
    %22 = arith.extui %21 : i1 to i32
    %c0_i32_13 = arith.constant 0 : i32
    %23 = arith.cmpi ne, %22, %c0_i32_13 : i32
    scf.if %23 {
      %c0_14 = arith.constant 0 : index
      %c0_15 = arith.constant 0 : index
      %24 = vector.load %arg6[%c0_14, %c0_15] : memref<128x128xf32, #tpu.memory_space<vmem>>, vector<128x128xf32>
      %c0_16 = arith.constant 0 : index
      %c0_17 = arith.constant 0 : index
      %25 = vector.load %arg5[%c0_16, %c0_17] : memref<128x128xf32, #tpu.memory_space<vmem>>, vector<128x128xf32>
      tpu.vector_store %arg5[%c0_16, %c0_17], %24 {strides = array<i32>} : memref<128x128xf32, #tpu.memory_space<vmem>>, vector<128x128xf32>,
    } else {
    }
    return
  }
  func.func @transform_0(%arg0: i32, %arg1: i32) -> (i32, i32) {
    %c0_i32 = arith.constant 0 : i32
    %c0_i32_0 = arith.constant 0 : i32
    return %arg0, %c0_i32 : i32, i32
  }
  func.func @transform_1(%arg0: i32, %arg1: i32) -> (i32, i32, i32) {
    %c0_i32 = arith.constant 0 : i32
    %c0_i32_0 = arith.constant 0 : i32
    %c0_i32_1 = arith.constant 0 : i32
    return %arg1, %c0_i32, %c0_i32_0 : i32, i32, i32
  }
  func.func @transform_2(%arg0: i32, %arg1: i32) -> (i32, i32) {
    %c0_i32 = arith.constant 0 : i32
    %c0_i32_0 = arith.constant 0 : i32
    return %arg1, %c0_i32 : i32, i32
  }
  func.func @transform_3(%arg0: i32, %arg1: i32) -> (i32, i32) {
    %c0_i32 = arith.constant 0 : i32
    %c0_i32_0 = arith.constant 0 : i32
    return %arg0, %c0_i32 : i32, i32
  }
}

</mosaic_0001>

<bundles_post_ra>
// kernel: _glu_forward.1
= control target key start
LH: loop header
LB: loop body
LE: loop exit
PB: predicated region body
PF: predicated region fallthrough
CT: control target
= control target key end

     0   :  { %s2039_s0 = inlined_call_operand.hbm [shape: f32[256,128], index: 0, kind: input, shape index: {}]   ;;  %s2040_s1 = inlined_call_operand.hbm [shape: f32[3,128,256], index: 1, kind: input, shape index: {}]   ;;  %s2041_s2 = inlined_call_operand.hbm [shape: f32[384,128], index: 2, kind: input, shape index: {}]   ;;  %s2042_s3 = inlined_call_operand.hbm [shape: f32[256,128], index: 3, kind: output, shape index: {}]  }
   0x1   :  { %2051 = sst [smem:[#allocation20_spill]] %s2039_s0 }
   0x2   :  { %2052 = sst [smem:[#allocation21_spill]] %s2040_s1 }
   0x3   :  { %2053 = sst [smem:[#allocation22_spill]] %s2042_s3 }
   0x4   :  { %8 = vsyncpa [#allocation4], 0 }
   0x5   :  { %10 = vsyncpa [#allocation4 + $0x1], 0 }
   0x6   :  { %11 = vsyncpa [#allocation7], 0 }
   0x7   :  { %13 = vsyncpa [#allocation7 + $0x1], 0 }
   0x8   :  { %14 = vsyncpa [#allocation5], 0 }
   0x9   :  { %16 = vsyncpa [#allocation5 + $0x1], 0  ;;  %s1583_s12 = smov 0   ;;  %s1585_s13 = smov 0  }
   0xa   :  { %s1587_s14 = smov 0   ;;  %s1589_s15 = smov 0  }
   0xb   :  { %s1591_s16 = smov 0   ;;  %s1593_s17 = smov 0  }
   0xc   :  { %s1595_s18 = smov 0   ;;  %s1597_s19 = smov 0  }
   0xd   :  { %s1599_s20 = smov 0   ;;  %s1601_s21 = smov 0  }
   0xe   :  { %s1603_s22 = smov 0  }
   0xf LB: > { %2054 = sst [smem:[#allocation13_spill]] %s1517_s14  ;;  %s1637_s23 = sadd.s32 4294967295, %s1549_s22   ;;  %s1549_s22 = sphi %s1603_s22, %s22_s22   ;;  %s1545_s21 = sphi %s1601_s21, %s2094_s21   ;;  %s1541_s20 = sphi %s1599_s20, %s2093_s20   ;;  %s1537_s19 = sphi %s1597_s19, %s2092_s19   ;;  %s1533_s18 = sphi %s1595_s18, %s2091_s18   ;;  %s1529_s17 = sphi %s1593_s17, %s2090_s17   ;;  %s1525_s16 = sphi %s1591_s16, %s2089_s16   ;;  %s1521_s15 = sphi %s1589_s15, %s2088_s15   ;;  %s1517_s14 = sphi %s1587_s14, %s2087_s14   ;;  %s1513_s13 = sphi %s1585_s13, %s2086_s13   ;;  %s1509_s12 = sphi %s1583_s12, %s2085_s12  }
  0x10   : > { %2055 = sst [smem:[#allocation14_spill]] %s1521_s15  ;;  %s31_s24 = sadd.s32 1, %s1541_s20 }
  0x11   : > { %2056 = sst [smem:[#allocation15_spill]] %s1533_s18  ;;  %p1640_p0 = scmp.ge.s32.totalorder %s31_s24, 3 }
  0x12   : > { %2057 = sst [smem:[#allocation16_spill]] %s1537_s19  ;;  %p49_p1 = scmp.eq.s32.totalorder %s1549_s22, 0 }
  0x13   : > { %p55_p2 = scmp.eq.s32.totalorder %s1637_s23, 0  ;;  %s67_s26 = sadd.s32 1, %s1517_s14 }
  0x14   : > { %s2096_s24 = smov (%p1640_p0, %s31_s24), 0  ;;  %p74_p3 = scmp.ne.s32.totalorder %s1517_s14, %s1513_s13 }
  0x15   : > { %2059 = sst [smem:[#allocation17_spill]] %s2096_s24  ;;  %p80_p4 = scmp.ne.s32.totalorder %s1513_s13, %s1509_s12 }
  0x16   : > { %s64_s27 = ssub.s32 %s1541_s20, %s2096_s24  ;;  %p76_p6 = por %p74_p3, %p49_p1 }
  0x17   : > { %p65_p5 = scmp.eq.s32.totalorder %s64_s27, 0  ;;  %p1660_p7 = por %p80_p4, %p55_p2 }
  0x18   : > { %p2045_p8 = scmp.lt.s32.totalorder %s1549_s22, 6  ;;  %s177_s30 = sand.u32 1, %s1549_s22  }
  0x19   : > { %s1666_s29 = scalar_select %p65_p5, %s1517_s14, %s67_s26  }
  0x1a   : > { %s179_s4 = sand.u32 1, %s1517_s14   ;;  %s1066_s6 = sshll.u32 %s1541_s20, 12 }
  0x1b   : > { %2061 = sst [smem:[#allocation18_spill]] %s1666_s29  ;;  %s1031_s5 = sshll.u32 %s179_s4, 8 }
  0x1c   : > { %s2062_s1 = sld [smem:[#allocation21_spill]]  ;;  %s181_s10 = scalar_lea.vmem [#allocation6], %s1031_s5 }
  0x1d   : > { %s188_s11 = sshll.u32 %s181_s10, 4  ;;  %p1676_p9 = pnand %p2045_p8, %p76_p6  ;;  %s189_s11 = int_to_ptr.vmem [resolvable:$true] %s188_s11 }
  0x1e   : > { %s1034_s26 = sshll.u32 %s179_s4, 7  ;;  %s1680_s27 = scalar_lea.sflag [#allocation7], %s177_s30 }
  0x1f   : > { %p2044_p10 = pneg %p1676_p9  ;;  %s1354_s24 = scalar_lea.vmem %s189_s11, 4096 }
  0x20   : > { %p1355_p11 = scmp.ne.s32.totalorder %s189_s11, %s1354_s24  ;;  %s1551_s5 = smov [#allocation6]  }
  0x22   : > { %s187_s9 = scalar_lea.hbm %s2062_s1, %s1066_s6  ;;  %p1357_p12 = pnand %p1355_p11, %p2044_p10 }
  0x23   : > { %s1359_s6 = sshll.u32 %s1551_s5, 4  ;;  %s1360_s6 = int_to_ptr.vmem [resolvable:$false] %s1359_s6 }
  0x24   : > { %p1358_p13 = pneg %p1357_p12  ;;  %s1361_s7 = scalar_lea.vmem %s1360_s6, 8192 }
  0x25   : > { %p1362_p3 = scmp.lt.s32.totalorder %s189_s11, %s1360_s6  ;;  %p1363_p4 = scmp.lt.s32.totalorder %s1361_s7, %s1354_s24 }
  0x27   : > { %p1364_p5 = por %p1363_p4, %p1362_p3 }
  0x29   : > { %p1365_p6 = pnand %p1364_p5, %p1358_p13 }
  0x2b   : > { %1368 = shalt.err (!%p1365_p6)
}
  0x2c   : > { %s1552_s4 = smov 256   ;;  %s1553_s24 = smov 16  }
  0x2d   : > { %1171 = dma.hbm_to_vmem [thread:$0]  (!%p1676_p9), %s187_s9, 4096, %s189_s11, %s1680_s27, %s1552_s4, %s1552_s4, %s1553_s24  }
  0x2e   : > { %p1037_p11 = scmp.ge.s32.totalorder %s1549_s22, 1  ;;  %s202_s30 = scalar_lea.vmem [#allocation8], %s1034_s26 }
  0x2f   : > { %s1691_s8 = sshll.u32 %s202_s30, 4  ;;  %p217_p12 = scmp.lt.s32.totalorder %s1549_s22, 7  ;;  %s210_s8 = int_to_ptr.vmem [resolvable:$true] %s1691_s8 }
  0x30   : > { %s1025_s5 = sadd.s32 4294967294, %s1549_s22   ;;  %s34_s6 = sadd.s32 1, %s1545_s21 }
  0x31   : > { %p1694_p13 = pnand %p1037_p11, %p217_p12  ;;  %s41_s7 = sadd.s32 1, %s1529_s17 }
  0x32   : > { %s2098_s6 = smov (!%p1640_p0, %s34_s6), %s1545_s21  ;;  %p48_p3 = scmp.ne.s32.totalorder %s1529_s17, %s1525_s16 }
  0x33   : > { %p54_p4 = scmp.ne.s32.totalorder %s1525_s16, %s1521_s15  ;;  %p36_p5 = scmp.ge.s32.totalorder %s2098_s6, 2 }
  0x34   : > { %p130_p6 = scmp.eq.s32.totalorder %s1637_s23, 5  ;;  %p1711_p10 = por %p49_p1, %p48_p3 }
  0x35   : > { %p1717_p11 = por %p55_p2, %p54_p4  ;;  %s2100_s6 = smov (%p36_p5, %s2098_s6), 0 }
  0x36   : > { %2067 = sst [smem:[#allocation19_spill]] %s2100_s6  ;;  %p1723_p0 = por %p130_p6, %p48_p3 }
  0x37   : > { %p136_p12 = scmp.eq.s32.totalorder %s1025_s5, 5  ;;  %s38_s26 = ssub.s32 %s1545_s21, %s2100_s6 }
  0x38   : > { %s2068_s25 = scalar_select %p1723_p0, 1, 0 }
  0x39   : > { %s156_s4 = sand.u32 1, %s1529_s17   ;;  %p39_p1 = scmp.eq.s32.totalorder %s38_s26, 0 }
  0x3a   : > { %p1730_p8 = por %p136_p12, %p54_p4  ;;  %s1028_s30 = sshll.u32 %s156_s4, 7 }
  0x3b   : > { %s1735_s1 = scalar_select %p39_p1, %s1529_s17, %s41_s7  }
  0x3c   : > { %s2069_s24 = scalar_select %p1730_p8, 1, 0 }
  0x3d   : > { %s1065_s29 = sshll.u32 %s1545_s21, 11  ;;  %s2070_s0 = sld [smem:[#allocation20_spill]] }
  0x3e   : > { %s160_s19 = scalar_lea.vmem [#allocation3], %s1028_s30  ;;  %p2071_p2 = scmp.lt.s32.totalorder %s1549_s22, 6 }
  0x3f   : > { %s167_s18 = sshll.u32 %s160_s19, 4  ;;  %s1067_s26 = sshll.u32 %s1541_s20, 11  ;;  %s168_s18 = int_to_ptr.vmem [resolvable:$true] %s167_s18 }
  0x40   : > { %p1745_p3 = pnand %p2071_p2, %p1711_p10  ;;  %s157_s6 = scalar_lea.sflag [#allocation4], %s156_s4 }
  0x41   : > { %s1382_s7 = scalar_lea.vmem %s168_s18, 2048  ;;  %s1554_s14 = smov [#allocation3]  }
  0x42   : > { %p1371_p4 = pneg %p1745_p3  ;;  %p1383_p5 = scmp.ne.s32.totalorder %s168_s18, %s1382_s7 }
  0x43   : > { %s166_s3 = scalar_lea.hbm %s2070_s0, %s1065_s29  ;;  %s1387_s15 = sshll.u32 %s1554_s14, 4  ;;  %s1388_s15 = int_to_ptr.vmem [resolvable:$false] %s1387_s15 }
  0x44   : > { %p1385_p6 = pnand %p1383_p5, %p1371_p4  ;;  %s1389_s19 = scalar_lea.vmem %s1388_s15, 4096 }
  0x45   : > { %p1390_p1 = scmp.lt.s32.totalorder %s168_s18, %s1388_s15  ;;  %p1391_p8 = scmp.lt.s32.totalorder %s1389_s19, %s1382_s7 }
  0x46   : > { %p1386_p12 = pneg %p1385_p6 }
  0x47   : > { %p1392_p0 = por %p1391_p8, %p1390_p1 }
  0x49   : > { %p1393_p10 = pnand %p1392_p0, %p1386_p12 }
  0x4b   : > { %1396 = shalt.err (!%p1393_p10)
}
  0x4c   : > { %s1555_s29 = smov 128   ;;  %s1556_s9 = smov 8  }
  0x4d   : > { %1168 = dma.hbm_to_vmem [thread:$0]  (!%p1745_p3), %s166_s3, 2048, %s168_s18, %s157_s6, %s1555_s29, %s1555_s29, %s1556_s9  }
  0x4e   : > { %s208_s0 = scalar_lea.hbm %s2041_s2, %s1067_s26  ;;  %s1410_s14 = scalar_lea.vmem %s210_s8, 2048 }
  0x4f   : > { %p1411_p2 = scmp.ne.s32.totalorder %s210_s8, %s1410_s14  ;;  %p2073_p4 = pneg %p1676_p9 }
  0x50   : > { %s1557_s7 = smov [#allocation8]  }
  0x51   : > { %p1413_p5 = pnand %p1411_p2, %p2073_p4  ;;  %s1415_s15 = sshll.u32 %s1557_s7, 4  ;;  %s1416_s15 = int_to_ptr.vmem [resolvable:$false] %s1415_s15 }
  0x52   : > { %s1417_s19 = scalar_lea.vmem %s1416_s15, 4096  ;;  %p1418_p0 = scmp.lt.s32.totalorder %s210_s8, %s1416_s15 }
  0x53   : > { %p1414_p8 = pneg %p1413_p5  ;;  %p1419_p6 = scmp.lt.s32.totalorder %s1417_s19, %s1410_s14 }
  0x55   : > { %p1420_p12 = por %p1419_p6, %p1418_p0 }
  0x57   : > { %p1421_p1 = pnand %p1420_p12, %p1414_p8 }
  0x59   : > { %1424 = shalt.err (!%p1421_p1)
}
  0x5a   : > { %1174 = dma.hbm_to_vmem [thread:$0]  (!%p1676_p9), %s208_s0, 2048, %s210_s8, %s1680_s27, %s1555_s29, %s1555_s29, %s1556_s9  }
  0x5b   : > { %221 = sbr.rel (%p1694_p13) target bundleno = 683 (0x2ab), region = 32  ;;  %s1767_s3 = sand.u32 (!%p1694_p13), 1, %s1525_s16  }
  0x5c   : > { %s1038_s18 = sshll.u32 (!%p1694_p13), %s1767_s3, 7  ;;  %s224_s6 = scalar_lea.sflag (!%p1694_p13), [#allocation4], %s1767_s3 }
  0x5d   : > { %s1771_s5 = scalar_lea.vmem (!%p1694_p13), [#allocation3], %s1038_s18 }
  0x60   : > { %1496 = dma.done.wait (%p1717_p11), %s224_s6, 2048  }
  0x61   : > { %1498 = vsyncadd (%p1717_p11), %s224_s6, 4294965248  ;;  %s232_s0 = sand.u32 1, %s1637_s23   ;;  %s234_s12 = sand.u32 1, %s1513_s13  }
  0x62   : > { %s1039_s27 = sshll.u32 %s234_s12, 8  ;;  %s233_s8 = scalar_lea.sflag [#allocation7], %s232_s0 }
  0x63   : > { %s1779_s10 = scalar_lea.vmem [#allocation6], %s1039_s27 }
  0x64   : > { %1500 = dma.done.wait (%p1660_p7), %s233_s8, 6144  }
  0x65   : > { %1502 = vsyncadd (%p1660_p7), %s233_s8, 4294961152  ;;  %s1040_s26 = sshll.u32 %s234_s12, 7  ;;  %s1787_s9 = scalar_lea.vmem [#allocation9], %s1038_s18 }
  0x66   : > { %s1785_s29 = scalar_lea.vmem [#allocation8], %s1040_s26  ;;  %s2074_s11 = sld [smem:[#allocation15_spill]] }
  0x6c   : > { %p1042_p9 = scmp.ne.s32.totalorder %s2074_s11, 0 }
  0x6e   : > { %284 = sbr.rel (%p1042_p9) target bundleno = 124 (0x7c), region = 48 }
  0x73   : > { %v1558_v0 = vmov 0.0  }
  0x74   : > { %285 = vst [vmem:[#allocation2 + $0x30] sm:$0xff] %v1558_v0  ;;  %286 = vst [vmem:[#allocation2] sm:$0xff] %v1558_v0 }
  0x75   : > { %287 = vst [vmem:[#allocation2 + $0x58] sm:$0xff] %v1558_v0  ;;  %288 = vst [vmem:[#allocation2 + $0x18] sm:$0xff] %v1558_v0 }
  0x76   : > { %289 = vst [vmem:[#allocation2 + $0x50] sm:$0xff] %v1558_v0  ;;  %290 = vst [vmem:[#allocation2 + $0x68] sm:$0xff] %v1558_v0 }
  0x77   : > { %291 = vst [vmem:[#allocation2 + $0x8] sm:$0xff] %v1558_v0  ;;  %292 = vst [vmem:[#allocation2 + $0x48] sm:$0xff] %v1558_v0 }
  0x78   : > { %293 = vst [vmem:[#allocation2 + $0x40] sm:$0xff] %v1558_v0  ;;  %294 = vst [vmem:[#allocation2 + $0x20] sm:$0xff] %v1558_v0 }
  0x79   : > { %295 = vst [vmem:[#allocation2 + $0x10] sm:$0xff] %v1558_v0  ;;  %296 = vst [vmem:[#allocation2 + $0x38] sm:$0xff] %v1558_v0 }
  0x7a   : > { %297 = vst [vmem:[#allocation2 + $0x60] sm:$0xff] %v1558_v0  ;;  %298 = vst [vmem:[#allocation2 + $0x70] sm:$0xff] %v1558_v0 }
  0x7b   : > { %299 = vst [vmem:[#allocation2 + $0x78] sm:$0xff] %v1558_v0  ;;  %300 = vst [vmem:[#allocation2 + $0x28] sm:$0xff] %v1558_v0 }
  0x7c PF: > { %v348_v1 = vld [vmem:[%s1779_s10 + $0xf8] sm:$0xff]  ;;  %v347_v2 = vld [vmem:[%s1779_s10 + $0xf0] sm:$0xff]  ;;  %v346_v3 = vld [vmem:[%s1779_s10 + $0xe8] sm:$0xff]  ;;  %v1559_v5 = vmov 0.0   ;;  %s2075_s23 = sld [smem:[#allocation15_spill]] }
  0x7d   : > { %349 = vmatprep.subr.mxu0 %v348_v1  ;;  %v345_v4 = vld [vmem:[%s1779_s10 + $0xe0] sm:$0xff]  ;;  %413 = vmatprep.mubr.f32.mxu0 %v1559_v5  ;;  %v344_v6 = vld [vmem:[%s1779_s10 + $0xd8] sm:$0xff]  ;;  %v343_v7 = vld [vmem:[%s1779_s10 + $0xd0] sm:$0xff] }
  0x7e   : > { %350 = vmatpush1.msra.mxu0 %v347_v2  ;;  %v342_v8 = vld [vmem:[%s1779_s10 + $0xc8] sm:$0xff]  ;;  %v341_v9 = vld [vmem:[%s1779_s10 + $0xc0] sm:$0xff]  ;;  %v340_v10 = vld [vmem:[%s1779_s10 + $0xb8] sm:$0xff] }
  0x7f   : > { %351 = vmatprep.subr.mxu0 %v346_v3  ;;  %v339_v11 = vld [vmem:[%s1779_s10 + $0xb0] sm:$0xff]  ;;  %v338_v12 = vld [vmem:[%s1779_s10 + $0xa8] sm:$0xff]  ;;  %v337_v13 = vld [vmem:[%s1779_s10 + $0xa0] sm:$0xff] }
  0x80   : > { %352 = vmatpush1.msra.mxu0 %v345_v4  ;;  %v336_v14 = vld [vmem:[%s1779_s10 + $0x98] sm:$0xff]  ;;  %v335_v15 = vld [vmem:[%s1779_s10 + $0x90] sm:$0xff]  ;;  %v334_v16 = vld [vmem:[%s1779_s10 + $0x88] sm:$0xff] }
  0x81   : > { %353 = vmatprep.subr.mxu0 %v344_v6  ;;  %v333_v17 = vld [vmem:[%s1779_s10 + $0x80] sm:$0xff]  ;;  %v332_v18 = vld [vmem:[%s1779_s10 + $0x78] sm:$0xff]  ;;  %v331_v19 = vld [vmem:[%s1779_s10 + $0x70] sm:$0xff] }
  0x82   : > { %354 = vmatpush1.msra.mxu0 %v343_v7  ;;  %v330_v20 = vld [vmem:[%s1779_s10 + $0x68] sm:$0xff]  ;;  %v329_v21 = vld [vmem:[%s1779_s10 + $0x60] sm:$0xff]  ;;  %v328_v22 = vld [vmem:[%s1779_s10 + $0x58] sm:$0xff]  ;;  %p1059_p7 = scmp.ne.s32.totalorder %s2075_s23, 2 }
  0x83   : > { %355 = vmatprep.subr.mxu0 %v342_v8  ;;  %v327_v23 = vld [vmem:[%s1779_s10 + $0x50] sm:$0xff]  ;;  %v326_v24 = vld [vmem:[%s1779_s10 + $0x48] sm:$0xff]  ;;  %v325_v25 = vld [vmem:[%s1779_s10 + $0x40] sm:$0xff] }
  0x84   : > { %356 = vmatpush1.msra.mxu0 %v341_v9  ;;  %v324_v26 = vld [vmem:[%s1779_s10 + $0x38] sm:$0xff]  ;;  %v323_v27 = vld [vmem:[%s1779_s10 + $0x30] sm:$0xff]  ;;  %v322_v28 = vld [vmem:[%s1779_s10 + $0x28] sm:$0xff] }
  0x85   : > { %357 = vmatprep.subr.mxu0 %v340_v10  ;;  %v321_v29 = vld [vmem:[%s1779_s10 + $0x20] sm:$0xff]  ;;  %v320_v30 = vld [vmem:[%s1779_s10 + $0x18] sm:$0xff]  ;;  %v319_v31 = vld [vmem:[%s1779_s10 + $0x10] sm:$0xff] }
  0x86   : > { %358 = vmatpush1.msra.mxu0 %v339_v11  ;;  %v318_v32 = vld [vmem:[%s1779_s10 + $0x8] sm:$0xff]  ;;  %v317_v33 = vld [vmem:[%s1779_s10] sm:$0xff]  ;;  %v303_v36 = vld [vmem:[%s1771_s5 + $0x10] sm:$0xff] }
  0x87   : > { %359 = vmatprep.subr.mxu0 %v338_v12  ;;  %v301_v34 = vld [vmem:[%s1771_s5] sm:$0xff]  ;;  %v302_v35 = vld [vmem:[%s1771_s5 + $0x8] sm:$0xff]  ;;  %v304_v37 = vld [vmem:[%s1771_s5 + $0x18] sm:$0xff] }
  0x88   : > { %360 = vmatpush1.msra.mxu0 %v337_v13  ;;  %v305_v38 = vld [vmem:[%s1771_s5 + $0x20] sm:$0xff]  ;;  %v306_v39 = vld [vmem:[%s1771_s5 + $0x28] sm:$0xff]  ;;  %v307_v40 = vld [vmem:[%s1771_s5 + $0x30] sm:$0xff] }
  0x89   : > { %361 = vmatprep.subr.mxu0 %v336_v14  ;;  %v308_v41 = vld [vmem:[%s1771_s5 + $0x38] sm:$0xff]  ;;  %v309_v42 = vld [vmem:[%s1771_s5 + $0x40] sm:$0xff]  ;;  %v310_v43 = vld [vmem:[%s1771_s5 + $0x48] sm:$0xff] }
  0x8a   : > { %362 = vmatpush1.msra.mxu0 %v335_v15  ;;  %v311_v44 = vld [vmem:[%s1771_s5 + $0x50] sm:$0xff]  ;;  %v312_v45 = vld [vmem:[%s1771_s5 + $0x58] sm:$0xff]  ;;  %v313_v46 = vld [vmem:[%s1771_s5 + $0x60] sm:$0xff] }
  0x8b   : > { %363 = vmatprep.subr.mxu0 %v334_v16  ;;  %v314_v47 = vld [vmem:[%s1771_s5 + $0x68] sm:$0xff]  ;;  %v315_v48 = vld [vmem:[%s1771_s5 + $0x70] sm:$0xff]  ;;  %v316_v49 = vld [vmem:[%s1771_s5 + $0x78] sm:$0xff] }
  0x8c   : > { %364 = vmatpush1.msra.mxu0 %v333_v17  ;;  %v669_v50 = vld [vmem:[%s1785_s29 + $0x78] sm:$0xff]  ;;  %v668_v51 = vld [vmem:[%s1785_s29 + $0x70] sm:$0xff]  ;;  %v667_v52 = vld [vmem:[%s1785_s29 + $0x68] sm:$0xff] }
  0x8d   : > { %365 = vmatprep.subr.mxu0 %v332_v18  ;;  %1101 = vmatprep.subr.mxu1 %v669_v50  ;;  %v666_v53 = vld [vmem:[%s1785_s29 + $0x60] sm:$0xff]  ;;  %v665_v54 = vld [vmem:[%s1785_s29 + $0x58] sm:$0xff]  ;;  %v664_v55 = vld [vmem:[%s1785_s29 + $0x50] sm:$0xff] }
  0x8e   : > { %366 = vmatpush1.msra.mxu0 %v331_v19  ;;  %1102 = vmatpush3.msra.mxu1 %v669_v50  ;;  %v663_v56 = vld [vmem:[%s1785_s29 + $0x48] sm:$0xff]  ;;  %v662_v57 = vld [vmem:[%s1785_s29 + $0x40] sm:$0xff]  ;;  %v661_v58 = vld [vmem:[%s1785_s29 + $0x38] sm:$0xff] }
  0x8f   : > { %367 = vmatprep.subr.mxu0 %v330_v20  ;;  %1103 = vmatprep.subr.mxu1 %v668_v51  ;;  %v660_v59 = vld [vmem:[%s1785_s29 + $0x30] sm:$0xff]  ;;  %v659_v60 = vld [vmem:[%s1785_s29 + $0x28] sm:$0xff]  ;;  %v658_v61 = vld [vmem:[%s1785_s29 + $0x20] sm:$0xff] }
  0x90   : > { %368 = vmatpush1.msra.mxu0 %v329_v21  ;;  %1104 = vmatpush3.msra.mxu1 %v668_v51  ;;  %v657_v62 = vld [vmem:[%s1785_s29 + $0x18] sm:$0xff]  ;;  %v656_v63 = vld [vmem:[%s1785_s29 + $0x10] sm:$0xff]  ;;  %v655_v0 = vld [vmem:[%s1785_s29 + $0x8] sm:$0xff] }
  0x91   : > { %369 = vmatprep.subr.mxu0 %v328_v22  ;;  %1105 = vmatprep.subr.mxu1 %v667_v52  ;;  %v654_v1 = vld [vmem:[%s1785_s29] sm:$0xff] }
  0x92   : > { %370 = vmatpush1.msra.mxu0 %v327_v23  ;;  %1106 = vmatpush3.msra.mxu1 %v667_v52 }
  0x93   : > { %371 = vmatprep.subr.mxu0 %v326_v24  ;;  %1107 = vmatprep.subr.mxu1 %v666_v53 }
  0x94   : > { %372 = vmatpush1.msra.mxu0 %v325_v25  ;;  %1108 = vmatpush3.msra.mxu1 %v666_v53 }
  0x95   : > { %373 = vmatprep.subr.mxu0 %v324_v26  ;;  %1109 = vmatprep.subr.mxu1 %v665_v54 }
  0x96   : > { %374 = vmatpush1.msra.mxu0 %v323_v27  ;;  %1110 = vmatpush3.msra.mxu1 %v665_v54 }
  0x97   : > { %375 = vmatprep.subr.mxu0 %v322_v28  ;;  %1111 = vmatprep.subr.mxu1 %v664_v55 }
  0x98   : > { %376 = vmatpush1.msra.mxu0 %v321_v29  ;;  %1112 = vmatpush3.msra.mxu1 %v664_v55 }
  0x99   : > { %377 = vmatprep.subr.mxu0 %v320_v30  ;;  %1113 = vmatprep.subr.mxu1 %v663_v56 }
  0x9a   : > { %378 = vmatpush1.msra.mxu0 %v319_v31  ;;  %1114 = vmatpush3.msra.mxu1 %v663_v56 }
  0x9b   : > { %379 = vmatprep.subr.mxu0 %v318_v32  ;;  %1115 = vmatprep.subr.mxu1 %v662_v57 }
  0x9c   : > { %380 = vmatpush1.msra.mxu0 %v317_v33  ;;  %1116 = vmatpush3.msra.mxu1 %v662_v57 }
  0x9d   : > { %414 = vmatmul.mubr.f32.vlgmr.msra.gmra.mxu0 %v301_v34  ;;  %1117 = vmatprep.subr.mxu1 %v661_v58 }
  0x9e   : > { %419 = vmatprep.mubr.f32.mxu0 %v1559_v5  ;;  %1118 = vmatpush3.msra.mxu1 %v661_v58 }
  0x9f   : > { %1119 = vmatprep.subr.mxu1 %v660_v59 }
  0xa0   : > { %1120 = vmatpush3.msra.mxu1 %v660_v59 }
  0xa1   : > { %420 = vmatmul.mubr.f32.gmra.mxu0 %v302_v35  ;;  %1121 = vmatprep.subr.mxu1 %v659_v60 }
  0xa2   : > { %425 = vmatprep.mubr.f32.mxu0 %v1559_v5  ;;  %1122 = vmatpush3.msra.mxu1 %v659_v60 }
  0xa3   : > { %1123 = vmatprep.subr.mxu1 %v658_v61 }
  0xa4   : > { %1124 = vmatpush3.msra.mxu1 %v658_v61 }
  0xa5   : > { %426 = vmatmul.mubr.f32.gmra.mxu0 %v303_v36  ;;  %1125 = vmatprep.subr.mxu1 %v657_v62 }
  0xa6   : > { %431 = vmatprep.mubr.f32.mxu0 %v1559_v5  ;;  %1126 = vmatpush3.msra.mxu1 %v657_v62 }
  0xa7   : > { %1127 = vmatprep.subr.mxu1 %v656_v63 }
  0xa8   : > { %1128 = vmatpush3.msra.mxu1 %v656_v63 }
  0xa9   : > { %432 = vmatmul.mubr.f32.gmra.mxu0 %v304_v37  ;;  %1129 = vmatprep.subr.mxu1 %v655_v0 }
  0xaa   : > { %437 = vmatprep.mubr.f32.mxu0 %v1559_v5  ;;  %1130 = vmatpush3.msra.mxu1 %v655_v0 }
  0xab   : > { %1131 = vmatprep.subr.mxu1 %v654_v1 }
  0xac   : > { %1132 = vmatpush3.msra.mxu1 %v654_v1 }
  0xad   : > { %438 = vmatmul.mubr.f32.gmra.mxu0 %v305_v38 }
  0xae   : > { %443 = vmatprep.mubr.f32.mxu0 %v1559_v5 }
  0xb1   : > { %444 = vmatmul.mubr.f32.gmra.mxu0 %v306_v39 }
  0xb2   : > { %449 = vmatprep.mubr.f32.mxu0 %v1559_v5 }
  0xb5   : > { %450 = vmatmul.mubr.f32.gmra.mxu0 %v307_v40 }
  0xb6   : > { %455 = vmatprep.mubr.f32.mxu0 %v1559_v5 }
  0xb9   : > { %456 = vmatmul.mubr.f32.gmra.mxu0 %v308_v41 }
  0xba   : > { %461 = vmatprep.mubr.f32.mxu0 %v1559_v5 }
  0xbd   : > { %462 = vmatmul.mubr.f32.gmra.mxu0 %v309_v42 }
  0xbe   : > { %467 = vmatprep.mubr.f32.mxu0 %v1559_v5 }
  0xc1   : > { %468 = vmatmul.mubr.f32.gmra.mxu0 %v310_v43 }
  0xc2   : > { %473 = vmatprep.mubr.f32.mxu0 %v1559_v5 }
  0xc5   : > { %474 = vmatmul.mubr.f32.gmra.mxu0 %v311_v44 }
  0xc6   : > { %479 = vmatprep.mubr.f32.mxu0 %v1559_v5 }
  0xc9   : > { %480 = vmatmul.mubr.f32.gmra.mxu0 %v312_v45 }
  0xca   : > { %485 = vmatprep.mubr.f32.mxu0 %v1559_v5 }
  0xcd   : > { %486 = vmatmul.mubr.f32.gmra.mxu0 %v313_v46 }
  0xce   : > { %491 = vmatprep.mubr.f32.mxu0 %v1559_v5 }
  0xd1   : > { %492 = vmatmul.mubr.f32.gmra.mxu0 %v314_v47 }
  0xd2   : > { %497 = vmatprep.mubr.f32.mxu0 %v1559_v5 }
  0xd5   : > { %498 = vmatmul.mubr.f32.gmra.mxu0 %v315_v48 }
  0xd6   : > { %503 = vmatprep.mubr.f32.mxu0 %v1559_v5 }
  0xd9   : > { %504 = vmatmul.mubr.f32.gmra.mxu0 %v316_v49 }
 0x15d   : > { %v415_v2 = vpop.f32.mrf.mxu0 }
 0x15f   : > { %v417_v3 = vpop.f32.mrf.mxu0 }
 0x160   : > { %v1043_v4 = vmul.f32 -1.442695, %v417_v3 }
 0x161   : > { %v421_v5 = vpop.f32.mrf.mxu0 }
 0x162   : > { %1277 = vpow2.f32 %v1043_v4 }
 0x163   : > { %v423_v6 = vpop.f32.mrf.mxu0 }
 0x164   : > { %v1044_v7 = vmul.f32 -1.442695, %v423_v6 }
 0x165   : > { %v1870_v8 = vpop.f32.mrf.mxu0 }
 0x166   : > { %1279 = vpow2.f32 %v1044_v7 }
 0x167   : > { %v429_v9 = vpop.f32.mrf.mxu0 }
 0x168   : > { %v1045_v10 = vmul.f32 -1.442695, %v429_v9 }
 0x169   : > { %v1872_v11 = vpop.f32.mrf.mxu0 }
 0x16a   : > { %1281 = vpow2.f32 %v1045_v10 }
 0x16b   : > { %v1874_v12 = vpop.f32.mrf.mxu0 }
 0x16c   : > { %v1046_v13 = vmul.f32 -1.442695, %v1874_v12 }
 0x16d   : > { %v1877_v14 = vpop.f32.mrf.mxu0 }
 0x16e   : > { %1283 = vpow2.f32 %v1046_v13 }
 0x16f   : > { %v1278_v15 = vpop.eup %1277  ;;  %v1879_v16 = vpop.f32.mrf.mxu0 }
 0x170   : > { %v558_v17 = vadd.f32 1.0, %v1278_v15  ;;  %v1047_v18 = vmul.f32 -1.442695, %v1879_v16 }
 0x171   : > { %v1882_v19 = vpop.f32.mrf.mxu0 }
 0x172   : > { %1285 = vrcp.f32 %v558_v17 }
 0x173   : > { %v1280_v20 = vpop.eup %1279  ;;  %1287 = vpow2.f32 %v1047_v18  ;;  %v1884_v21 = vpop.f32.mrf.mxu0 }
 0x174   : > { %v559_v22 = vadd.f32 1.0, %v1280_v20  ;;  %v1048_v23 = vmul.f32 -1.442695, %v1884_v21 }
 0x175   : > { %v1887_v24 = vpop.f32.mrf.mxu0 }
 0x176   : > { %1289 = vrcp.f32 %v559_v22 }
 0x177   : > { %v1282_v25 = vpop.eup %1281  ;;  %1291 = vpow2.f32 %v1048_v23  ;;  %v1889_v26 = vpop.f32.mrf.mxu0 }
 0x178   : > { %v560_v27 = vadd.f32 1.0, %v1282_v25  ;;  %v1049_v28 = vmul.f32 -1.442695, %v1889_v26 }
 0x179   : > { %v1892_v29 = vpop.f32.mrf.mxu0 }
 0x17a   : > { %1293 = vrcp.f32 %v560_v27 }
 0x17b   : > { %v1284_v30 = vpop.eup %1283  ;;  %1295 = vpow2.f32 %v1049_v28  ;;  %v1894_v31 = vpop.f32.mrf.mxu0 }
 0x17c   : > { %v561_v32 = vadd.f32 1.0, %v1284_v30  ;;  %v1050_v33 = vmul.f32 -1.442695, %v1894_v31 }
 0x17d   : > { %v1897_v34 = vpop.f32.mrf.mxu0 }
 0x17e   : > { %1297 = vrcp.f32 %v561_v32 }
 0x17f   : > { %v1286_v35 = vpop.eup %1285  ;;  %1299 = vpow2.f32 %v1050_v33  ;;  %v1899_v36 = vpop.f32.mrf.mxu0 }
 0x180   : > { %v1288_v37 = vpop.eup %1287  ;;  %v606_v38 = vmul.f32 %v1286_v35, %v417_v3  ;;  %v1051_v39 = vmul.f32 -1.442695, %v1899_v36 }
 0x181   : > { %v562_v40 = vadd.f32 1.0, %v1288_v37  ;;  %v1902_v41 = vpop.f32.mrf.mxu0 }
 0x182   : > { %1301 = vpow2.f32 %v1051_v39  ;;  %v622_v42 = vmul.f32 %v606_v38, %v415_v2 }
 0x183   : > { %v1290_v43 = vpop.eup %1289  ;;  %1303 = vrcp.f32 %v562_v40  ;;  %v1904_v44 = vpop.f32.mrf.mxu0 }
 0x184   : > { %v1292_v45 = vpop.eup %1291  ;;  %v607_v46 = vmul.f32 %v1290_v43, %v423_v6  ;;  %v1052_v47 = vmul.f32 -1.442695, %v1904_v44  ;;  %1133 = vmatprep.mubr.f32.mxu1 %v622_v42 }
 0x185   : > { %v563_v48 = vadd.f32 1.0, %v1292_v45  ;;  %v1907_v49 = vpop.f32.mrf.mxu0 }
 0x186   : > { %v623_v50 = vmul.f32 %v607_v46, %v421_v5  ;;  %1305 = vpow2.f32 %v1052_v47 }
 0x187   : > { %v1294_v51 = vpop.eup %1293  ;;  %1307 = vrcp.f32 %v563_v48  ;;  %v1909_v52 = vpop.f32.mrf.mxu0 }
 0x188   : > { %v1296_v53 = vpop.eup %1295  ;;  %v608_v54 = vmul.f32 %v1294_v51, %v429_v9  ;;  %v1053_v55 = vmul.f32 -1.442695, %v1909_v52  ;;  %1134 = vmatmul.mubr.f32.vlgmr.msra.gmra.mxu1 %v623_v50 }
 0x189   : > { %v564_v56 = vadd.f32 1.0, %v1296_v53  ;;  %v1912_v57 = vpop.f32.mrf.mxu0 }
 0x18a   : > { %v624_v58 = vmul.f32 %v608_v54, %v1870_v8  ;;  %1309 = vpow2.f32 %v1053_v55 }
 0x18b   : > { %v1298_v59 = vpop.eup %1297  ;;  %1311 = vrcp.f32 %v564_v56  ;;  %v1915_v60 = vpop.f32.mrf.mxu0 }
 0x18c   : > { %v1300_v61 = vpop.eup %1299  ;;  %v609_v62 = vmul.f32 %v1298_v59, %v1874_v12  ;;  %v1054_v63 = vmul.f32 -1.442695, %v1915_v60  ;;  %1136 = vmatprep.mubr.f32.mxu1 %v624_v58 }
 0x18d   : > { %v565_v0 = vadd.f32 1.0, %v1300_v61  ;;  %v1919_v1 = vpop.f32.mrf.mxu0 }
 0x18e   : > { %v625_v2 = vmul.f32 %v609_v62, %v1872_v11  ;;  %1313 = vpow2.f32 %v1054_v63 }
 0x18f   : > { %v1302_v3 = vpop.eup %1301  ;;  %1315 = vrcp.f32 %v565_v0  ;;  %v1922_v4 = vpop.f32.mrf.mxu0 }
 0x190   : > { %v1304_v5 = vpop.eup %1303  ;;  %v566_v6 = vadd.f32 1.0, %v1302_v3  ;;  %v1055_v7 = vmul.f32 -1.442695, %v1922_v4  ;;  %1137 = vmatmul.mubr.f32.gmra.mxu1 %v625_v2  ;;  %v639_v3 = vld [vmem:[#allocation2] sm:$0xff] }
 0x191   : > { %v610_v8 = vmul.f32 %v1304_v5, %v1879_v16  ;;  %v1926_v9 = vpop.f32.mrf.mxu0  ;;  %v638_v5 = vld [vmem:[#allocation2 + $0x30] sm:$0xff] }
 0x192   : > { %1317 = vrcp.f32 %v566_v6 }
 0x193   : > { %v1306_v10 = vpop.eup %1305  ;;  %v626_v12 = vmul.f32 %v610_v8, %v1877_v14  ;;  %1319 = vpow2.f32 %v1055_v7  ;;  %v1929_v11 = vpop.f32.mrf.mxu0  ;;  %v641_v8 = vld [vmem:[#allocation2 + $0x18] sm:$0xff] }
 0x194   : > { %v1308_v13 = vpop.eup %1307  ;;  %v567_v15 = vadd.f32 1.0, %v1306_v10  ;;  %v1056_v17 = vmul.f32 -1.442695, %v1929_v11  ;;  %v640_v10 = vld [vmem:[#allocation2 + $0x58] sm:$0xff] }
 0x195   : > { %v611_v18 = vmul.f32 %v1308_v13, %v1884_v21  ;;  %1139 = vmatprep.mubr.f32.mxu1 %v626_v12  ;;  %v1933_v20 = vpop.f32.mrf.mxu0 }
 0x196   : > { %1321 = vrcp.f32 %v567_v15  ;;  %v643_v15 = vld [vmem:[#allocation2 + $0x68] sm:$0xff] }
 0x197   : > { %v1310_v16 = vpop.eup %1309  ;;  %v627_v22 = vmul.f32 %v611_v18, %v1882_v19  ;;  %1323 = vpow2.f32 %v1056_v17  ;;  %v501_v23 = vpop.f32.mrf.mxu0  ;;  %v642_v18 = vld [vmem:[#allocation2 + $0x50] sm:$0xff] }
 0x198   : > { %v1312_v25 = vpop.eup %1311  ;;  %v568_v14 = vadd.f32 1.0, %v1310_v16  ;;  %v1057_v27 = vmul.f32 -1.442695, %v501_v23 }
 0x199   : > { %v612_v28 = vmul.f32 %v1312_v25, %v1889_v26  ;;  %1140 = vmatmul.mubr.f32.gmra.mxu1 %v627_v22  ;;  %v505_v30 = vpop.f32.mrf.mxu0 }
 0x19a   : > { %1325 = vrcp.f32 %v568_v14  ;;  %v644_v14 = vld [vmem:[#allocation2 + $0x8] sm:$0xff] }
 0x19b   : > { %v1314_v32 = vpop.eup %1313  ;;  %v628_v21 = vmul.f32 %v612_v28, %v1887_v24  ;;  %1327 = vpow2.f32 %v1057_v27  ;;  %v507_v33 = vpop.f32.mrf.mxu0 }
 0x19c   : > { %v1316_v35 = vpop.eup %1315  ;;  %v569_v37 = vadd.f32 1.0, %v1314_v32  ;;  %v1058_v38 = vmul.f32 -1.442695, %v507_v33  ;;  %v647_v32 = vld [vmem:[#allocation2 + $0x20] sm:$0xff] }
 0x19d   : > { %v613_v19 = vmul.f32 %v1316_v35, %v1894_v31  ;;  %1142 = vmatprep.mubr.f32.mxu1 %v628_v21 }
 0x19e   : > { %1329 = vrcp.f32 %v569_v37 }
 0x19f   : > { %v1318_v39 = vpop.eup %1317  ;;  %v629_v40 = vmul.f32 %v613_v19, %v1892_v29  ;;  %1331 = vpow2.f32 %v1058_v38  ;;  %v649_v19 = vld [vmem:[#allocation2 + $0x38] sm:$0xff] }
 0x1a0   : > { %v1320_v26 = vpop.eup %1319  ;;  %v614_v42 = vmul.f32 %v1318_v39, %v1899_v36 }
 0x1a1   : > { %v570_v43 = vadd.f32 1.0, %v1320_v26  ;;  %1143 = vmatmul.mubr.f32.gmra.mxu1 %v629_v40  ;;  %v648_v40 = vld [vmem:[#allocation2 + $0x10] sm:$0xff] }
 0x1a2   : > { %v630_v24 = vmul.f32 %v614_v42, %v1897_v34 }
 0x1a3   : > { %v1322_v45 = vpop.eup %1321  ;;  %1333 = vrcp.f32 %v570_v43 }
 0x1a4   : > { %v1324_v46 = vpop.eup %1323  ;;  %v615_v47 = vmul.f32 %v1322_v45, %v1904_v44  ;;  %1145 = vmatprep.mubr.f32.mxu1 %v630_v24  ;;  %v651_v24 = vld [vmem:[#allocation2 + $0x70] sm:$0xff] }
 0x1a5   : > { %v571_v31 = vadd.f32 1.0, %v1324_v46  ;;  %v650_v46 = vld [vmem:[#allocation2 + $0x60] sm:$0xff] }
 0x1a6   : > { %v631_v48 = vmul.f32 %v615_v47, %v1902_v41 }
 0x1a7   : > { %v1326_v50 = vpop.eup %1325  ;;  %1335 = vrcp.f32 %v571_v31 }
 0x1a8   : > { %v1328_v29 = vpop.eup %1327  ;;  %v616_v51 = vmul.f32 %v1326_v50, %v1909_v52  ;;  %1146 = vmatmul.mubr.f32.gmra.mxu1 %v631_v48  ;;  %v653_v50 = vld [vmem:[#allocation2 + $0x28] sm:$0xff] }
 0x1a9   : > { %v572_v36 = vadd.f32 1.0, %v1328_v29 }
 0x1aa   : > { %v632_v53 = vmul.f32 %v616_v51, %v1907_v49  ;;  %v652_v51 = vld [vmem:[#allocation2 + $0x78] sm:$0xff] }
 0x1ab   : > { %v1330_v54 = vpop.eup %1329  ;;  %1337 = vrcp.f32 %v572_v36 }
 0x1ac   : > { %v1332_v34 = vpop.eup %1331  ;;  %v617_v55 = vmul.f32 %v1330_v54, %v1915_v60  ;;  %1148 = vmatprep.mubr.f32.mxu1 %v632_v53 }
 0x1ad   : > { %v573_v44 = vadd.f32 1.0, %v1332_v34 }
 0x1ae   : > { %v633_v56 = vmul.f32 %v617_v55, %v1912_v57 }
 0x1af   : > { %1339 = vrcp.f32 %v573_v44 }
 0x1b0   : > { %v1334_v41 = vpop.eup %1333  ;;  %1149 = vmatmul.mubr.f32.gmra.mxu1 %v633_v56 }
 0x1b1   : > { %v618_v58 = vmul.f32 %v1334_v41, %v1922_v4 }
 0x1b3   : > { %v634_v52 = vmul.f32 %v618_v58, %v1919_v1 }
 0x1b4   : > { %v1336_v59 = vpop.eup %1335 }
 0x1b5   : > { %v619_v61 = vmul.f32 %v1336_v59, %v1929_v11  ;;  %1151 = vmatprep.mubr.f32.mxu1 %v634_v52 }
 0x1b7   : > { %v635_v49 = vmul.f32 %v619_v61, %v1926_v9 }
 0x1b8   : > { %v1338_v62 = vpop.eup %1337 }
 0x1b9   : > { %v620_v63 = vmul.f32 %v1338_v62, %v501_v23  ;;  %1152 = vmatmul.mubr.f32.gmra.mxu1 %v635_v49  ;;  %v645_v23 = vld [vmem:[#allocation2 + $0x48] sm:$0xff] }
 0x1bb   : > { %v636_v60 = vmul.f32 %v620_v63, %v1933_v20 }
 0x1bc   : > { %v1340_v0 = vpop.eup %1339 }
 0x1bd   : > { %v621_v57 = vmul.f32 %v1340_v0, %v507_v33  ;;  %1154 = vmatprep.mubr.f32.mxu1 %v636_v60  ;;  %v646_v33 = vld [vmem:[#allocation2 + $0x40] sm:$0xff] }
 0x1bf   : > { %v637_v2 = vmul.f32 %v621_v57, %v505_v30 }
 0x1c1   : > { %1155 = vmatmul.mubr.f32.gmra.mxu1 %v637_v2 }
 0x248   : > { %v1135_v4 = vpop.f32.mrf.mxu1 }
 0x249   : > { %v816_v1 = vadd.f32 %v1135_v4, %v639_v3 }
 0x24a   : > { %v736_v6 = vpop.f32.mrf.mxu1 }
 0x24b   : > { %832 = vst [vmem:[#allocation2] sm:$0xff] %v816_v1  ;;  %v815_v7 = vadd.f32 %v736_v6, %v638_v5 }
 0x24d   : > { %831 = vst [vmem:[#allocation2 + $0x30] sm:$0xff] %v815_v7 }
 0x250   : > { %v1138_v9 = vpop.f32.mrf.mxu1 }
 0x251   : > { %v818_v12 = vadd.f32 %v1138_v9, %v641_v8 }
 0x252   : > { %v746_v11 = vpop.f32.mrf.mxu1 }
 0x253   : > { %834 = vst [vmem:[#allocation2 + $0x18] sm:$0xff] %v818_v12  ;;  %v817_v13 = vadd.f32 %v746_v11, %v640_v10 }
 0x255   : > { %833 = vst [vmem:[#allocation2 + $0x58] sm:$0xff] %v817_v13 }
 0x259   : > { %v1141_v17 = vpop.f32.mrf.mxu1 }
 0x25a   : > { %v820_v20 = vadd.f32 %v1141_v17, %v643_v15 }
 0x25b   : > { %v756_v16 = vpop.f32.mrf.mxu1 }
 0x25c   : > { %836 = vst [vmem:[#allocation2 + $0x68] sm:$0xff] %v820_v20  ;;  %v819_v22 = vadd.f32 %v756_v16, %v642_v18 }
 0x25e   : > { %835 = vst [vmem:[#allocation2 + $0x50] sm:$0xff] %v819_v22 }
 0x261   : > { %v1144_v25 = vpop.f32.mrf.mxu1 }
 0x262   : > { %v822_v27 = vadd.f32 %v1144_v25, %v645_v23 }
 0x263   : > { %v766_v28 = vpop.f32.mrf.mxu1 }
 0x264   : > { %838 = vst [vmem:[#allocation2 + $0x48] sm:$0xff] %v822_v27  ;;  %v821_v30 = vadd.f32 %v766_v28, %v644_v14 }
 0x266   : > { %837 = vst [vmem:[#allocation2 + $0x8] sm:$0xff] %v821_v30 }
 0x268   : > { %v1147_v21 = vpop.f32.mrf.mxu1 }
 0x269   : > { %v824_v35 = vadd.f32 %v1147_v21, %v647_v32 }
 0x26a   : > { %v776_v37 = vpop.f32.mrf.mxu1 }
 0x26b   : > { %840 = vst [vmem:[#allocation2 + $0x20] sm:$0xff] %v824_v35  ;;  %v823_v38 = vadd.f32 %v776_v37, %v646_v33 }
 0x26d   : > { %839 = vst [vmem:[#allocation2 + $0x40] sm:$0xff] %v823_v38 }
 0x270   : > { %v1150_v39 = vpop.f32.mrf.mxu1 }
 0x271   : > { %v826_v26 = vadd.f32 %v1150_v39, %v649_v19 }
 0x272   : > { %v786_v42 = vpop.f32.mrf.mxu1 }
 0x273   : > { %842 = vst [vmem:[#allocation2 + $0x38] sm:$0xff] %v826_v26  ;;  %v825_v43 = vadd.f32 %v786_v42, %v648_v40 }
 0x275   : > { %841 = vst [vmem:[#allocation2 + $0x10] sm:$0xff] %v825_v43 }
 0x279   : > { %v1153_v45 = vpop.f32.mrf.mxu1 }
 0x27a   : > { %v828_v47 = vadd.f32 %v1153_v45, %v651_v24 }
 0x27b   : > { %v796_v31 = vpop.f32.mrf.mxu1 }
 0x27c   : > { %844 = vst [vmem:[#allocation2 + $0x70] sm:$0xff] %v828_v47  ;;  %v827_v48 = vadd.f32 %v796_v31, %v650_v46 }
 0x27e   : > { %843 = vst [vmem:[#allocation2 + $0x60] sm:$0xff] %v827_v48 }
 0x281   : > { %v1156_v29 = vpop.f32.mrf.mxu1 }
 0x282   : > { %v830_v36 = vadd.f32 %v1156_v29, %v653_v50  ;;  %850 = sbr.rel (%p1059_p7) target bundleno = 656 (0x290), region = 52 }
 0x283   : > { %v806_v53 = vpop.f32.mrf.mxu1 }
 0x284   : > { %846 = vst [vmem:[#allocation2 + $0x28] sm:$0xff] %v830_v36  ;;  %v829_v54 = vadd.f32 %v806_v53, %v652_v51 }
 0x286   : > { %845 = vst [vmem:[#allocation2 + $0x78] sm:$0xff] %v829_v54 }
 0x287   : > { %v851_v34 = vld [vmem:[#allocation2 + $0x30] sm:$0xff]  ;;  %v852_v55 = vld [vmem:[#allocation2] sm:$0xff]  ;;  %v853_v44 = vld [vmem:[#allocation2 + $0x58] sm:$0xff] }
 0x288   : > { %867 = vst [vmem:[%s1787_s9] sm:$0xff] %v851_v34  ;;  %868 = vst [vmem:[%s1787_s9 + $0x8] sm:$0xff] %v852_v55  ;;  %v854_v56 = vld [vmem:[#allocation2 + $0x18] sm:$0xff]  ;;  %v855_v41 = vld [vmem:[#allocation2 + $0x50] sm:$0xff] }
 0x289   : > { %869 = vst [vmem:[%s1787_s9 + $0x10] sm:$0xff] %v853_v44  ;;  %v856_v58 = vld [vmem:[#allocation2 + $0x68] sm:$0xff]  ;;  %870 = vst [vmem:[%s1787_s9 + $0x18] sm:$0xff] %v854_v56  ;;  %v859_v61 = vld [vmem:[#allocation2 + $0x40] sm:$0xff] }
 0x28a   : > { %871 = vst [vmem:[%s1787_s9 + $0x20] sm:$0xff] %v855_v41  ;;  %872 = vst [vmem:[%s1787_s9 + $0x28] sm:$0xff] %v856_v58  ;;  %v857_v52 = vld [vmem:[#allocation2 + $0x8] sm:$0xff]  ;;  %v860_v49 = vld [vmem:[#allocation2 + $0x20] sm:$0xff] }
 0x28b   : > { %v858_v59 = vld [vmem:[#allocation2 + $0x48] sm:$0xff]  ;;  %873 = vst [vmem:[%s1787_s9 + $0x30] sm:$0xff] %v857_v52  ;;  %875 = vst [vmem:[%s1787_s9 + $0x40] sm:$0xff] %v859_v61  ;;  %v861_v62 = vld [vmem:[#allocation2 + $0x10] sm:$0xff] }
 0x28c   : > { %874 = vst [vmem:[%s1787_s9 + $0x38] sm:$0xff] %v858_v59  ;;  %v862_v63 = vld [vmem:[#allocation2 + $0x38] sm:$0xff]  ;;  %876 = vst [vmem:[%s1787_s9 + $0x48] sm:$0xff] %v860_v49  ;;  %v863_v60 = vld [vmem:[#allocation2 + $0x60] sm:$0xff] }
 0x28d   : > { %877 = vst [vmem:[%s1787_s9 + $0x50] sm:$0xff] %v861_v62  ;;  %878 = vst [vmem:[%s1787_s9 + $0x58] sm:$0xff] %v862_v63  ;;  %v864_v0 = vld [vmem:[#allocation2 + $0x70] sm:$0xff]  ;;  %v865_v57 = vld [vmem:[#allocation2 + $0x78] sm:$0xff] }
 0x28e   : > { %879 = vst [vmem:[%s1787_s9 + $0x60] sm:$0xff] %v863_v60  ;;  %880 = vst [vmem:[%s1787_s9 + $0x68] sm:$0xff] %v864_v0  ;;  %v866_v2 = vld [vmem:[#allocation2 + $0x28] sm:$0xff] }
 0x28f   : > { %881 = vst [vmem:[%s1787_s9 + $0x70] sm:$0xff] %v865_v57  ;;  %882 = vst [vmem:[%s1787_s9 + $0x78] sm:$0xff] %v866_v2 }
 0x290 PF: > { %s2076_s28 = sld [smem:[#allocation16_spill]]  ;;  %s897_s19 = sshll.u32 %s1787_s9, 4  ;;  %s1977_s19 = int_to_ptr.vmem [resolvable:$true] %s897_s19 }
 0x291   : > { %s2077_s7 = sld [smem:[#allocation22_spill]]  ;;  %s884_s18 = scalar_lea.sflag [#allocation5], %s1767_s3 }
 0x292   : > { %s1425_s6 = scalar_lea.vmem %s1977_s19, 2048  ;;  %p2078_p11 = scmp.ne.s32.totalorder %s2068_s25, 0 }
 0x293   : > { %p1426_p13 = scmp.ne.s32.totalorder %s1977_s19, %s1425_s6  ;;  %s1560_s5 = smov [#allocation9]  }
 0x294   : > { %s1429_s0 = sshll.u32 %s1560_s5, 4  ;;  %s1430_s0 = int_to_ptr.vmem [resolvable:$false] %s1429_s0 }
 0x295   : > { %p1427_p3 = pnand %p1426_p13, %p2078_p11  ;;  %s1431_s12 = scalar_lea.vmem %s1430_s0, 4096 }
 0x296   : > { %s1068_s4 = sshll.u32 %s2076_s28, 11  ;;  %p1432_p2 = scmp.lt.s32.totalorder %s1977_s19, %s1430_s0 }
 0x297   : > { %s1974_s15 = scalar_lea.hbm %s2077_s7, %s1068_s4  ;;  %p1428_p10 = pneg %p1427_p3 }
 0x298   : > { %p1433_p4 = scmp.lt.s32.totalorder %s1431_s12, %s1425_s6 }
 0x29a   : > { %p1434_p5 = por %p1433_p4, %p1432_p2 }
 0x29c   : > { %p1435_p8 = pnand %p1434_p5, %p1428_p10 }
 0x29e   : > { %1438 = shalt.err (!%p1435_p8)
}
 0x29f   : > { %s1439_s27 = scalar_lea.hbm %s1974_s15, 2048  ;;  %s1443_s26 = scalar_lea.hbm %s2077_s7, 4096 }
 0x2a0   : > { %p1440_p0 = scmp.ne.s32.totalorder %s1974_s15, %s1439_s27  ;;  %p1444_p1 = scmp.lt.s32.totalorder %s1974_s15, %s2077_s7 }
 0x2a1   : > { %p1445_p9 = scmp.lt.s32.totalorder %s1443_s26, %s1439_s27 }
 0x2a2   : > { %p1441_p6 = pnand %p1440_p0, %p2078_p11 }
 0x2a3   : > { %p1446_p7 = por %p1445_p9, %p1444_p1 }
 0x2a4   : > { %p1442_p12 = pneg %p1441_p6 }
 0x2a6   : > { %p1447_p13 = pnand %p1446_p7, %p1442_p12 }
 0x2a8   : > { %1450 = shalt.err (!%p1447_p13)
}
 0x2a9   : > { %s1561_s11 = smov 128   ;;  %s1562_s23 = smov 8  }
 0x2aa   : > { %1163 = dma.vmem_to_hbm [thread:$0]  (%p2078_p11), %s1977_s19, 2048, %s1974_s15, %s884_s18, %s1561_s11, %s1561_s11, %s1562_s23  }
 0x2ab PF: > { %s2079_s28 = sld [smem:[#allocation14_spill]]  ;;  %p1180_p3 = scmp.ge.s32.totalorder %s1549_s22, 2 }
 0x2ac   : > { %p2080_p10 = scmp.ne.s32.totalorder %s2069_s24, 0 }
 0x2ae   : > { %p1176_p2 = pnand %p1180_p3, %p2080_p10 }
 0x2b0   : > { %p1177_p4 = pneg %p1176_p2 }
 0x2b1   : > { %s912_s4 = sand.u32 1, %s2079_s28  }
 0x2b2   : > { %s913_s30 = scalar_lea.sflag [#allocation5], %s912_s4 }
 0x2b3   : > { %1504 = dma.done.wait (%p1177_p4), %s913_s30, 2048  }
 0x2b4   : > { %1506 = vsyncadd (%p1177_p4), %s913_s30, 4294965248  ;;  %s22_s22 = sadd.s32 1, %s1549_s22   ;;  %s2081_s14 = sld [smem:[#allocation13_spill]] }
 0x2b5   : > { %p19_p5 = scmp.ge.s32.totalorder %s22_s22, 8   ;;  %s2082_s25 = sld [smem:[#allocation18_spill]] }
 0x2b6   : > { %s2083_s3 = sld [smem:[#allocation17_spill]]  ;;  %s2085_s12 = smov %s1513_s13 }
 0x2b7   : > { %s2084_s6 = sld [smem:[#allocation19_spill]]  ;;  %s2088_s15 = smov %s1525_s16 }
 0x2b8   : > { %s2089_s16 = smov %s1529_s17  ;;  %s2090_s17 = smov %s1735_s1 }
 0x2b9   : > { %s2091_s18 = smov %s1541_s20  ;;  %s2092_s19 = smov %s1545_s21 }
 0x2ba   : > { %s2086_s13 = smov %s2081_s14  ;;  %21 = sbr.rel (!%p19_p5) target bundleno = 15 (0xf), region = 109 }
 0x2bb   : > { %s2087_s14 = smov %s2082_s25 }
 0x2bc   : > { %s2093_s20 = smov %s2083_s3 }
 0x2bd   : > { %s2094_s21 = smov %s2084_s6 }
 0x2bf   :  { %918 = vsyncpa [#allocation4], 1 }
 0x2c0   :  { %920 = vsyncpa [#allocation4 + $0x1], 1 }
 0x2c1   :  { %921 = vsyncpa [#allocation7], 1 }
 0x2c2   :  { %923 = vsyncpa [#allocation7 + $0x1], 1 }
 0x2c3   :  { %924 = vsyncpa [#allocation5], 1 }
 0x2c4   :  { %926 = vsyncpa [#allocation5 + $0x1], 1 }

</bundles_post_ra>
